<compile_context>
chip_gen: v7x
topology: tpu7x:2x2x1
jax: 0.10.0
libtpu: 0.0.40
codegen_flags: <defaults>
</compile_context>

<pallas_src>
import math
import functools

import jax
import jax.numpy as jnp
from jax.experimental import pallas as pl
from jax.experimental.pallas import tpu as pltpu


def _round_up(v, m):
    return (v + m - 1) // m * m


def _ffn_kernel(x_ref, w1_ref, b1_ref, w2_ref, b2_ref, o_ref, acc_ref):
    k = pl.program_id(1)

    @pl.when(k == 0)
    def _():
        acc_ref[...] = jnp.zeros_like(acc_ref)

    # First linear (bf16 MXU matmul, f32 accumulate) + bias + exact GELU in f32.
    h = jnp.dot(x_ref[...], w1_ref[...], preferred_element_type=jnp.float32)
    h = h + b1_ref[...]                                   # (TM, tH) + (1, tH)
    h = 0.5 * h * (1.0 + jax.lax.erf(h * (1.0 / math.sqrt(2.0))))

    # Second linear: accumulate this hidden-tile's contribution into the f32 scratch.
    acc_ref[...] += jnp.dot(h.astype(w2_ref.dtype), w2_ref[...],
                            preferred_element_type=jnp.float32)

    @pl.when(k == pl.num_programs(1) - 1)
    def _():
        o_ref[...] = (acc_ref[...] + b2_ref[...]).astype(o_ref.dtype)


@functools.partial(jax.jit, static_argnames=("tile_m", "tile_h"))
def feed_forward(x, w1, b1, w2, b2, *, tile_m=None, tile_h=None):
    """x: (batch, seq, dim). Returns (batch, seq, dim).

    Weights are stored transposed relative to PyTorch: W1 is (dim, hidden),
    W2 is (hidden, dim).
    """
    B, S, D = x.shape
    H = w1.shape[1]
    M = B * S
    out_dtype = x.dtype

    # ---- tiling / padding choices -------------------------------------------------
    # Lane-dense feature dims (multiples of 128).
    D_p = _round_up(D, 128)
    H_p = _round_up(H, 128)

    # Row tile: default 512 rows (good fraction of HBM roofline), multiple of 16
    # (bf16 sublane packing), capped by the (padded) problem size.
    if tile_m is None:
        tile_m = min(512, _round_up(M, 16))
    tile_m = _round_up(tile_m, 16)
    M_p = _round_up(M, tile_m)
    # NOTE: for large M this yields >= 2 M-tiles so the "parallel" axis can be
    # sharded across v7x's two TensorCores.

    # Hidden tile: stream weights in 512-wide chunks (multiple of 128).
    if tile_h is None:
        tile_h = min(512, H_p)
    tile_h = _round_up(tile_h, 128)
    H_p = _round_up(H_p, tile_h)

    grid = (M_p // tile_m, H_p // tile_h)

    # ---- cast + pad operands (zero padding is exact for this computation) ----------
    x2 = jnp.pad(x.reshape(M, D).astype(jnp.bfloat16),
                 ((0, M_p - M), (0, D_p - D)))
    w1_p = jnp.pad(w1.astype(jnp.bfloat16), ((0, D_p - D), (0, H_p - H)))
    w2_p = jnp.pad(w2.astype(jnp.bfloat16), ((0, H_p - H), (0, D_p - D)))
    b1_p = jnp.pad(b1.astype(jnp.float32), ((0, H_p - H),)).reshape(1, H_p)
    b2_p = jnp.pad(b2.astype(jnp.float32), ((0, D_p - D),)).reshape(1, D_p)

    # ---- explicit VMEM budget (double-buffered tiles + f32 accumulator) -------------
    out_bytes = jnp.dtype(out_dtype).itemsize
    tile_bytes = (tile_m * D_p * 2          # x tile (bf16)
                  + D_p * tile_h * 2        # W1 tile (bf16)
                  + tile_h * D_p * 2        # W2 tile (bf16)
                  + tile_h * 4 + D_p * 4    # bias tiles (f32)
                  + tile_m * D_p * out_bytes)  # output tile
    vmem_needed = 2 * tile_bytes + tile_m * D_p * 4   # + accumulator scratch
    vmem_limit = int(min(max(32 << 20, 2 * vmem_needed), 64 << 20))

    out = pl.pallas_call(
        _ffn_kernel,
        out_shape=jax.ShapeDtypeStruct((M_p, D_p), out_dtype),
        grid_spec=pltpu.PrefetchScalarGridSpec(
            num_scalar_prefetch=0,
            grid=grid,
            in_specs=[
                pl.BlockSpec((tile_m, D_p), lambda i, k: (i, 0)),   # x rows (reused over k)
                pl.BlockSpec((D_p, tile_h), lambda i, k: (0, k)),   # W1 hidden-tile (streamed)
                pl.BlockSpec((1, tile_h),   lambda i, k: (0, k)),   # b1 hidden-tile
                pl.BlockSpec((tile_h, D_p), lambda i, k: (k, 0)),   # W2 hidden-tile (streamed)
                pl.BlockSpec((1, D_p),      lambda i, k: (0, 0)),   # b2 (invariant)
            ],
            out_specs=pl.BlockSpec((tile_m, D_p), lambda i, k: (i, 0)),
            scratch_shapes=[pltpu.VMEM((tile_m, D_p), jnp.float32)],
        ),
        compiler_params=pltpu.CompilerParams(
            dimension_semantics=("parallel", "arbitrary"),
            vmem_limit_bytes=vmem_limit,
        ),
    )(x2, w1_p, b1_p, w2_p, b2_p)

    return out[:M, :D].reshape(B, S, D)


def init_params(key, dim, hidden_dim, dtype=jnp.float32):
    """Deterministic init matching nn.Linear shapes (weights stored transposed
    relative to PyTorch: W1 is (dim, hidden), W2 is (hidden, dim))."""
    k1, k2, k3, k4 = jax.random.split(key, 4)
    lim1 = 1.0 / math.sqrt(dim)
    lim2 = 1.0 / math.sqrt(hidden_dim)
    w1 = jax.random.uniform(k1, (dim, hidden_dim), dtype, -lim1, lim1)
    b1 = jax.random.uniform(k2, (hidden_dim,), dtype, -lim1, lim1)
    w2 = jax.random.uniform(k3, (hidden_dim, dim), dtype, -lim2, lim2)
    b2 = jax.random.uniform(k4, (dim,), dtype, -lim2, lim2)
    return w1, b1, w2, b2


if __name__ == "__main__":
    key = jax.random.PRNGKey(0)
    k_x, k_p = jax.random.split(key)

    batch, seq, dim, hidden_dim = 2, 8, 32, 64
    x = jax.random.normal(k_x, (batch, seq, dim), jnp.float32)
    w1, b1, w2, b2 = init_params(k_p, dim, hidden_dim)

    y = feed_forward(x, w1, b1, w2, b2)
    y = jax.block_until_ready(y)

    # Pure-JAX f32 reference (exact GELU; dropout p=0 is identity). The kernel's
    # matmuls run in bf16 on the MXU, so compare with a bf16-commensurate tolerance.
    h_ref = x.reshape(-1, dim) @ w1 + b1
    h_ref = 0.5 * h_ref * (1.0 + jax.lax.erf(h_ref / jnp.sqrt(2.0)))
    y_ref = (h_ref @ w2 + b2).reshape(batch, seq, dim)
    assert y.shape == y_ref.shape
    assert jnp.allclose(y, y_ref, atol=5e-2, rtol=5e-2), "mismatch vs reference"

    print("KERNEL_OK")
</pallas_src>

<mosaic_0001>
module attributes {stable_mosaic.version = 11 : i64} {
  func.func @_ffn_kernel(%arg0: i32, %arg1: i32, %arg2: memref<16x128xbf16, #tpu.memory_space<vmem>>, %arg3: memref<128x128xbf16, #tpu.memory_space<vmem>>, %arg4: memref<1x128xf32, #tpu.memory_space<vmem>>, %arg5: memref<128x128xbf16, #tpu.memory_space<vmem>>, %arg6: memref<1x128xf32, #tpu.memory_space<vmem>>, %arg7: memref<16x128xf32, #tpu.memory_space<vmem>>, %arg8: memref<16x128xf32, #tpu.memory_space<vmem>>) attributes {dimension_semantics = [#tpu.dimension_semantics<parallel>, #tpu.dimension_semantics<arbitrary>], iteration_bounds = array<i64: 1, 1>, scalar_prefetch = 0 : i64, scratch_operands = 1 : i64, tpu.core_type = #tpu.core_type<tc>, window_params = [{transform_indices = @transform_0, window_bounds = array<i64: 16, 128>}, {transform_indices = @transform_1, window_bounds = array<i64: 128, 128>}, {transform_indices = @transform_2, window_bounds = array<i64: 1, 128>}, {transform_indices = @transform_3, window_bounds = array<i64: 128, 128>}, {pipeline_mode = #tpu.pipeline_mode<synchronous>, transform_indices = @transform_4, window_bounds = array<i64: 1, 128>}, {transform_indices = @transform_5, window_bounds = array<i64: 16, 128>}]} {
    %c0_i32 = arith.constant 0 : i32
    %0 = arith.cmpi eq, %arg1, %c0_i32 : i32
    %1 = arith.extui %0 : i1 to i32
    %c0_i32_0 = arith.constant 0 : i32
    %2 = arith.cmpi ne, %1, %c0_i32_0 : i32
    scf.if %2 {
      %cst_18 = arith.constant 0.000000e+00 : f32
      %26 = vector.broadcast %cst_18 : f32 to vector<16x128xf32>
      %c0_19 = arith.constant 0 : index
      %c0_20 = arith.constant 0 : index
      %27 = vector.load %arg8[%c0_19, %c0_20] : memref<16x128xf32, #tpu.memory_space<vmem>>, vector<16x128xf32>
      tpu.vector_store %arg8[%c0_19, %c0_20], %26 {strides = array<i32>} : memref<16x128xf32, #tpu.memory_space<vmem>>, vector<16x128xf32>,
    } else {
    }
    %c0 = arith.constant 0 : index
    %c0_1 = arith.constant 0 : index
    %3 = vector.load %arg2[%c0, %c0_1] : memref<16x128xbf16, #tpu.memory_space<vmem>>, vector<16x128xbf16>
    %c0_2 = arith.constant 0 : index
    %c0_3 = arith.constant 0 : index
    %4 = vector.load %arg3[%c0_2, %c0_3] : memref<128x128xbf16, #tpu.memory_space<vmem>>, vector<128x128xbf16>
    %cst = arith.constant dense<0.000000e+00> : vector<16x128xf32>
    %5 = tpu.matmul %3, %4, %cst {dimension_numbers = #tpu.dot_dimension_numbers<[1], [0], [0], [1], [0, 0, 1, 1], [], []>} : vector<16x128xbf16>, vector<128x128xbf16>, vector<16x128xf32> -> vector<16x128xf32>
    %c0_4 = arith.constant 0 : index
    %c0_5 = arith.constant 0 : index
    %6 = vector.load %arg4[%c0_4, %c0_5] : memref<1x128xf32, #tpu.memory_space<vmem>>, vector<1x128xf32>
    %7 = vector.broadcast %6 : vector<1x128xf32> to vector<16x128xf32>
    %8 = arith.addf %5, %7 : vector<16x128xf32>
    %cst_6 = arith.constant 5.000000e-01 : f32
    %9 = vector.broadcast %cst_6 : f32 to vector<16x128xf32>
    %10 = arith.mulf %9, %8 : vector<16x128xf32>
    %cst_7 = arith.constant 0.707106769 : f32
    %11 = vector.broadcast %cst_7 : f32 to vector<16x128xf32>
    %12 = arith.mulf %8, %11 : vector<16x128xf32>
    %13 = math.erf %12 : vector<16x128xf32>
    %cst_8 = arith.constant 1.000000e+00 : f32
    %14 = vector.broadcast %cst_8 : f32 to vector<16x128xf32>
    %15 = arith.addf %14, %13 : vector<16x128xf32>
    %16 = arith.mulf %10, %15 : vector<16x128xf32>
    %c0_9 = arith.constant 0 : index
    %c0_10 = arith.constant 0 : index
    %17 = vector.load %arg8[%c0_9, %c0_10] : memref<16x128xf32, #tpu.memory_space<vmem>>, vector<16x128xf32>
    %18 = arith.truncf %16 : vector<16x128xf32> to vector<16x128xbf16>
    %c0_11 = arith.constant 0 : index
    %c0_12 = arith.constant 0 : index
    %19 = vector.load %arg5[%c0_11, %c0_12] : memref<128x128xbf16, #tpu.memory_space<vmem>>, vector<128x128xbf16>
    %cst_13 = arith.constant dense<0.000000e+00> : vector<16x128xf32>
    %20 = tpu.matmul %18, %19, %cst_13 {dimension_numbers = #tpu.dot_dimension_numbers<[1], [0], [0], [1], [0, 0, 1, 1], [], []>} : vector<16x128xbf16>, vector<128x128xbf16>, vector<16x128xf32> -> vector<16x128xf32>
    %21 = arith.addf %17, %20 : vector<16x128xf32>
    %c0_14 = arith.constant 0 : index
    %c0_15 = arith.constant 0 : index
    %22 = vector.load %arg8[%c0_14, %c0_15] : memref<16x128xf32, #tpu.memory_space<vmem>>, vector<16x128xf32>
    tpu.vector_store %arg8[%c0_14, %c0_15], %21 {strides = array<i32>} : memref<16x128xf32, #tpu.memory_space<vmem>>, vector<16x128xf32>,
    %c0_i32_16 = arith.constant 0 : i32
    %23 = arith.cmpi eq, %arg1, %c0_i32_16 : i32
    %24 = arith.extui %23 : i1 to i32
    %c0_i32_17 = arith.constant 0 : i32
    %25 = arith.cmpi ne, %24, %c0_i32_17 : i32
    scf.if %25 {
      %c0_18 = arith.constant 0 : index
      %c0_19 = arith.constant 0 : index
      %26 = vector.load %arg8[%c0_18, %c0_19] : memref<16x128xf32, #tpu.memory_space<vmem>>, vector<16x128xf32>
      %c0_20 = arith.constant 0 : index
      %c0_21 = arith.constant 0 : index
      %27 = vector.load %arg6[%c0_20, %c0_21] : memref<1x128xf32, #tpu.memory_space<vmem>>, vector<1x128xf32>
      %28 = vector.broadcast %27 : vector<1x128xf32> to vector<16x128xf32>
      %29 = arith.addf %26, %28 : vector<16x128xf32>
      %c0_22 = arith.constant 0 : index
      %c0_23 = arith.constant 0 : index
      %30 = vector.load %arg7[%c0_22, %c0_23] : memref<16x128xf32, #tpu.memory_space<vmem>>, vector<16x128xf32>
      tpu.vector_store %arg7[%c0_22, %c0_23], %29 {strides = array<i32>} : memref<16x128xf32, #tpu.memory_space<vmem>>, vector<16x128xf32>,
    } else {
    }
    return
  }
  func.func @transform_0(%arg0: i32, %arg1: i32) -> (i32, i32) {
    %c0_i32 = arith.constant 0 : i32
    %c0_i32_0 = arith.constant 0 : i32
    return %arg0, %c0_i32 : i32, i32
  }
  func.func @transform_1(%arg0: i32, %arg1: i32) -> (i32, i32) {
    %c0_i32 = arith.constant 0 : i32
    %c0_i32_0 = arith.constant 0 : i32
    return %c0_i32, %arg1 : i32, i32
  }
  func.func @transform_2(%arg0: i32, %arg1: i32) -> (i32, i32) {
    %c0_i32 = arith.constant 0 : i32
    %c0_i32_0 = arith.constant 0 : i32
    return %c0_i32, %arg1 : i32, i32
  }
  func.func @transform_3(%arg0: i32, %arg1: i32) -> (i32, i32) {
    %c0_i32 = arith.constant 0 : i32
    %c0_i32_0 = arith.constant 0 : i32
    return %arg1, %c0_i32 : i32, i32
  }
  func.func @transform_4(%arg0: i32, %arg1: i32) -> (i32, i32) {
    %c0_i32 = arith.constant 0 : i32
    %c0_i32_0 = arith.constant 0 : i32
    %c0_i32_1 = arith.constant 0 : i32
    return %c0_i32, %c0_i32_0 : i32, i32
  }
  func.func @transform_5(%arg0: i32, %arg1: i32) -> (i32, i32) {
    %c0_i32 = arith.constant 0 : i32
    %c0_i32_0 = arith.constant 0 : i32
    return %arg0, %c0_i32 : i32, i32
  }
}

</mosaic_0001>

<bundles_post_ra>
// kernel: feed_forward.1
= control target key start
LH: loop header
LB: loop body
LE: loop exit
PB: predicated region body
PF: predicated region fallthrough
CT: control target
= control target key end

     0   :  { %v389_v0 = vmov 0.0   ;;  %vm390_vm0 = vmmov 0   ;;  %s484_s1 = inlined_call_operand.vmem [shape: bf16[128,128], index: 1, kind: input, shape index: {}]   ;;  %s485_s3 = inlined_call_operand.vmem [shape: bf16[128,128], index: 3, kind: input, shape index: {}]   ;;  %s486_s0 = inlined_call_operand.vmem [shape: bf16[16,128], index: 0, kind: input, shape index: {}]   ;;  %s487_s2 = inlined_call_operand.vmem [shape: f32[1,128], index: 2, kind: input, shape index: {}]   ;;  %s488_s4 = inlined_call_operand.vmem [shape: f32[1,128], index: 4, kind: input, shape index: {}]   ;;  %s489_s5 = inlined_call_operand.vmem [shape: f32[16,128], index: 5, kind: output, shape index: {}]  }
   0x1   :  { %326 = vmatprep.subr.bf16.mxu0 %v389_v0  ;;  %v368_v1 = vld [vmem:[%s484_s1] sm:$0xff]   ;;  %342 = vmatprep.mubr.msk.bf16.mxu0 %vm390_vm0, %v389_v0  ;;  %v369_v2 = vld [vmem:[%s484_s1 + $0x8] sm:$0xff]   ;;  %v370_v3 = vld [vmem:[%s484_s1 + $0x10] sm:$0xff]  }
   0x2   :  { %346 = vmatprep.subr.bf16.mxu1 %v389_v0  ;;  %362 = vmatprep.mubr.msk.bf16.mxu1 %vm390_vm0, %v389_v0  ;;  %v377_v4 = vld [vmem:[%s485_s3] sm:$0xff]   ;;  %v371_v5 = vld [vmem:[%s484_s1 + $0x18] sm:$0xff]   ;;  %v378_v6 = vld [vmem:[%s485_s3 + $0x8] sm:$0xff]  }
   0x3   :  { %327 = vmatpush3.bf16.msra.mxu0 %v368_v1  ;;  %347 = vmatpush3.bf16.msra.mxu1 %v377_v4  ;;  %v372_v7 = vld [vmem:[%s484_s1 + $0x20] sm:$0xff]   ;;  %v373_v8 = vld [vmem:[%s484_s1 + $0x28] sm:$0xff]   ;;  %v374_v9 = vld [vmem:[%s484_s1 + $0x30] sm:$0xff]  }
   0x4   :  { %328 = vmatprep.subr.bf16.mxu0 %v389_v0  ;;  %348 = vmatprep.subr.bf16.mxu1 %v389_v0  ;;  %v375_v10 = vld [vmem:[%s484_s1 + $0x38] sm:$0xff]   ;;  %v376_v11 = vld [vmem:[%s486_s0] sm:$0xff]   ;;  %v379_v12 = vld [vmem:[%s485_s3 + $0x10] sm:$0xff]  }
   0x5   :  { %v380_v13 = vld [vmem:[%s485_s3 + $0x18] sm:$0xff]   ;;  %v381_v14 = vld [vmem:[%s485_s3 + $0x20] sm:$0xff]   ;;  %v382_v15 = vld [vmem:[%s485_s3 + $0x28] sm:$0xff]  }
   0x6   :  { %v383_v16 = vld [vmem:[%s485_s3 + $0x30] sm:$0xff]   ;;  %v384_v17 = vld [vmem:[%s485_s3 + $0x38] sm:$0xff]   ;;  %v289_v18 = vld [vmem:[%s487_s2] ss:$0 sm:$0xff] }
   0x7   :  { %329 = vmatpush3.bf16.msra.mxu0 %v369_v2  ;;  %349 = vmatpush3.bf16.msra.mxu1 %v378_v6  ;;  %v307_v36 = vld [vmem:[%s488_s4] ss:$0 sm:$0xff] }
   0x8   :  { %330 = vmatprep.subr.bf16.mxu0 %v389_v0  ;;  %350 = vmatprep.subr.bf16.mxu1 %v389_v0 }
   0xb   :  { %331 = vmatpush3.bf16.msra.mxu0 %v370_v3  ;;  %351 = vmatpush3.bf16.msra.mxu1 %v379_v12 }
   0xc   :  { %332 = vmatprep.subr.bf16.mxu0 %v389_v0  ;;  %352 = vmatprep.subr.bf16.mxu1 %v389_v0 }
   0xf   :  { %333 = vmatpush3.bf16.msra.mxu0 %v371_v5  ;;  %353 = vmatpush3.bf16.msra.mxu1 %v380_v13 }
  0x10   :  { %334 = vmatprep.subr.bf16.mxu0 %v389_v0  ;;  %354 = vmatprep.subr.bf16.mxu1 %v389_v0 }
  0x13   :  { %335 = vmatpush3.bf16.msra.mxu0 %v372_v7  ;;  %355 = vmatpush3.bf16.msra.mxu1 %v381_v14 }
  0x14   :  { %336 = vmatprep.subr.bf16.mxu0 %v389_v0  ;;  %356 = vmatprep.subr.bf16.mxu1 %v389_v0 }
  0x17   :  { %337 = vmatpush3.bf16.msra.mxu0 %v373_v8  ;;  %357 = vmatpush3.bf16.msra.mxu1 %v382_v15 }
  0x18   :  { %338 = vmatprep.subr.bf16.mxu0 %v389_v0  ;;  %358 = vmatprep.subr.bf16.mxu1 %v389_v0 }
  0x1b   :  { %339 = vmatpush3.bf16.msra.mxu0 %v374_v9  ;;  %359 = vmatpush3.bf16.msra.mxu1 %v383_v16 }
  0x1c   :  { %340 = vmatprep.subr.bf16.mxu0 %v389_v0  ;;  %360 = vmatprep.subr.bf16.mxu1 %v389_v0 }
  0x1f   :  { %341 = vmatpush3.bf16.msra.mxu0 %v375_v10  ;;  %361 = vmatpush3.bf16.msra.mxu1 %v384_v17 }
  0x22   :  { %343 = vmatmul.mubr.bf16.vlgmr.msra.gmra.mrb[0].mxu0 %v376_v11 }
  0xf5   :  { %v140_v19 = vpop.f32.mrb[0].mxu0 }
  0xf6   :  { %v141_v20 = vadd.f32 %v289_v18, %v140_v19  ;;  %v344_v21 = vpop.f32.mrb[1].mxu0 }
  0xf7   :  { %v143_v22 = vpop.f32.mrb[2].mxu0 }
  0xf8   :  { %v149_v23 = vmul.f32 0.70710677, %v141_v20  ;;  %v144_v24 = vadd.f32 %v289_v18, %v143_v22  ;;  %v345_v25 = vpop.f32.mrb[3].mxu0  ;;  %v147_v30 = vmul.f32 0.5, %v141_v20 }
  0xfa   :  { %385 = verf.f32 %v149_v23  ;;  %v150_v26 = vmul.f32 0.70710677, %v144_v24  ;;  %v148_v31 = vmul.f32 0.5, %v144_v24 }
  0xfc   :  { %387 = verf.f32 %v150_v26 }
 0x104   :  { %v386_v27 = vpop.eup %385 }
 0x105   :  { %v153_v28 = vadd.f32 1.0, %v386_v27 }
 0x106   :  { %v388_v29 = vpop.eup %387 }
 0x107   :  { %v154_v32 = vadd.f32 1.0, %v388_v29  ;;  %v155_v33 = vmul.f32 %v153_v28, %v147_v30 }
 0x109   :  { %v156_v34 = vmul.f32 %v154_v32, %v148_v31 }
 0x10b   :  { %v159_v35 = vpack.c.bf16 %v156_v34, %v155_v33 }
 0x10d   :  { %363 = vmatmul.mubr.bf16.vlgmr.msra.gmra.mrb[0].mxu1 %v159_v35 }
 0x1e0   :  { %v258_v37 = vpop.f32.mrb[0].mxu1 }
 0x1e1   :  { %v281_v38 = vadd.f32 %v307_v36, %v258_v37  ;;  %v364_v39 = vpop.f32.mrb[1].mxu1 }
 0x1e2   :  { %v261_v40 = vpop.f32.mrb[2].mxu1 }
 0x1e3   :  { %283 = vst [vmem:[%s489_s5] sm:$0xff] %v281_v38  ;;  %v282_v41 = vadd.f32 %v307_v36, %v261_v40  ;;  %v365_v42 = vpop.f32.mrb[3].mxu1 }
 0x1e5   :  { %284 = vst [vmem:[%s489_s5 + $0x8] sm:$0xff] %v282_v41 }

</bundles_post_ra>
